<compile_context>
chip_gen: v6e
topology: v6e:2x2x1
jax: 0.10.0
libtpu: 0.0.40
codegen_flags: <defaults>
</compile_context>

<pallas_src>
import functools

import jax
import jax.numpy as jnp
from jax.experimental import pallas as pl
from jax.experimental.pallas import tpu as pltpu


# ----------------------------------------------------------------------------- helpers
def _swish_f32(z):
    # sigmoid(z)*z == 0.5*z*(1 + tanh(z/2)); single EUP op (tanh), mul/add on VALU.
    return 0.5 * z * (1.0 + jnp.tanh(0.5 * z))


def _vmem_capacity_bytes():
    # Per-TensorCore VMEM (v5e/v6e: 128 MiB, v7x: 64 MiB). Conservative fallback.
    try:
        return int(pltpu.get_tpu_info().vmem_capacity_bytes)
    except Exception:
        return 64 * 1024 * 1024


def _pick_batch_tile(B, per_row_bytes, budget):
    """Largest MXU-friendly batch tile that (a) gives >= 2 grid steps, (b) gives an
    even number of tiles (v7x megacore split), and (c) fits the VMEM stream budget."""
    candidates = (512, 256, 128, 64, 32, 16, 8)
    for tb in candidates:
        if 2 * tb > B or tb * per_row_bytes > budget:
            continue
        if pl.cdiv(B, tb) % 2 == 0:
            return tb
    for tb in candidates:  # relax the even-tile-count preference
        if 2 * tb <= B and tb * per_row_bytes <= budget:
            return tb
    for tb in candidates:  # relax the >=2-tiles requirement
        if tb <= B and tb * per_row_bytes <= budget:
            return tb
    return B               # tiny batch: single full-batch tile


def _pick_k_tile(D):
    """Hidden-dim (K) tile for the streamed-weight path; lane-aligned, >=2 steps."""
    for tk in (512, 256, 128):
        if D % tk == 0 and D // tk >= 2:
            return tk
    return D


# ----------------------------------------------------------------------------- kernels
def _residual_block_kernel(x_ref, w1_ref, b1_ref, w2_ref, b2_ref, o_ref):
    """Resident-weights path: W1/W2 stay in VMEM, x/out streamed over the batch."""
    xb = x_ref[...].astype(w1_ref.dtype)          # MXU operands in bf16

    # Linear1 + Swish   (f32 accumulate / epilogue)
    h = jnp.dot(xb, w1_ref[...], preferred_element_type=jnp.float32) + b1_ref[...]
    h = _swish_f32(h)

    # Linear2
    h2 = jnp.dot(h.astype(w2_ref.dtype), w2_ref[...],
                 preferred_element_type=jnp.float32) + b2_ref[...]

    # Residual + outer Swish.  Re-load x (plain vld) instead of keeping it live
    # across both matmuls -> avoids vreg spills at larger batch tiles.
    y = x_ref[...].astype(jnp.float32) + h2
    o_ref[...] = _swish_f32(y).astype(o_ref.dtype)


def _residual_block_kernel_stream_k(x_ref, w1_ref, b1_ref, w2_ref, b2_ref, o_ref,
                                    acc_ref):
    """Streamed-weights path: hidden dim tiled as a reduction ('arbitrary') axis.

    Per k-step:  h_k = swish(x @ W1t[:, kblk] + b1[kblk]);  acc += h_k @ W2t[kblk, :]
    Last step:   out = swish(x + acc + b2)
    """
    k = pl.program_id(1)

    @pl.when(k == 0)
    def _():
        acc_ref[...] = jnp.zeros_like(acc_ref)

    xb = x_ref[...].astype(w1_ref.dtype)
    h = jnp.dot(xb, w1_ref[...], preferred_element_type=jnp.float32) + b1_ref[...]
    h = _swish_f32(h)
    acc_ref[...] += jnp.dot(h.astype(w2_ref.dtype), w2_ref[...],
                            preferred_element_type=jnp.float32)

    @pl.when(k == pl.num_programs(1) - 1)
    def _():
        y = x_ref[...].astype(jnp.float32) + acc_ref[...] + b2_ref[...]
        o_ref[...] = _swish_f32(y).astype(o_ref.dtype)


# ----------------------------------------------------------------------------- wrapper
def prepare_params(w1, b1, w2, b2, *, mxu_dtype=jnp.bfloat16):
    """One-time parameter prep (hoisted out of the per-call path).

    w1, w2: PyTorch-convention (out, in) Linear weights; b1, b2: (out,).
    Returns weights pre-transposed to (in, out) in `mxu_dtype` and biases as (1, D) f32.
    """
    D = w1.shape[0]
    w1_t = jnp.asarray(w1).T.astype(mxu_dtype)
    w2_t = jnp.asarray(w2).T.astype(mxu_dtype)
    b1_r = jnp.asarray(b1, jnp.float32).reshape(1, D)
    b2_r = jnp.asarray(b2, jnp.float32).reshape(1, D)
    return w1_t, b1_r, w2_t, b2_r


@functools.partial(jax.jit, static_argnames=("force_stream_k",))
def residual_block(x, w1_t, b1_r, w2_t, b2_r, *, force_stream_k=False):
    """x: (B, D) f32 or bf16.  w*_t: (D, D) pre-transposed (in, out).  b*_r: (1, D) f32.
    Output dtype follows x (bf16 I/O halves HBM traffic for this bandwidth-bound op)."""
    B, D = x.shape
    xbytes = x.dtype.itemsize
    wbytes = jnp.dtype(w1_t.dtype).itemsize

    cap = _vmem_capacity_bytes()              # per-TensorCore
    budget = int(0.85 * cap)                  # leave headroom for compiler scratch
    vmem_limit = int(0.88 * cap)

    # Weights budgeted at 2x: the pipeliner may double-buffer the constant-index
    # specs; on v7x they are also duplicated per TensorCore (cap is per-TC).
    resident_weight_bytes = 2 * (2 * D * D * wbytes) + 2 * (2 * D * 4)
    stream_budget = budget - resident_weight_bytes
    use_stream = force_stream_k or stream_budget <= 0

    cost = pl.CostEstimate(
        flops=4 * B * D * D,                                   # two (B,D)x(D,D) matmuls
        transcendentals=2 * B * D,                             # two tanh per element
        bytes_accessed=2 * B * D * xbytes + 2 * D * D * wbytes + 2 * D * 4,
    )

    if not use_stream:
        # x + out tiles, double-buffered.  (If a profile shows exposed DMA at small D,
        # bump the x spec to pipeline_mode=pl.Buffered(3); 2-deep is the default.)
        per_row = 2 * 2 * D * xbytes
        TB = _pick_batch_tile(B, per_row, stream_budget)
        grid = (pl.cdiv(B, TB),)
        return pl.pallas_call(
            _residual_block_kernel,
            out_shape=jax.ShapeDtypeStruct((B, D), x.dtype),
            grid_spec=pltpu.PrefetchScalarGridSpec(
                num_scalar_prefetch=0,
                grid=grid,
                in_specs=[
                    pl.BlockSpec((TB, D), lambda i: (i, 0)),   # x tile (streamed)
                    pl.BlockSpec((D, D), lambda i: (0, 0)),    # W1^T (VMEM-resident)
                    pl.BlockSpec((1, D), lambda i: (0, 0)),    # b1
                    pl.BlockSpec((D, D), lambda i: (0, 0)),    # W2^T (VMEM-resident)
                    pl.BlockSpec((1, D), lambda i: (0, 0)),    # b2
                ],
                out_specs=pl.BlockSpec((TB, D), lambda i: (i, 0)),
            ),
            compiler_params=pltpu.CompilerParams(
                dimension_semantics=("parallel",),             # megacore split on v7x
                vmem_limit_bytes=vmem_limit,
            ),
            cost_estimate=cost,
        )(x, w1_t, b1_r, w2_t, b2_r)

    # ---- streamed-K fallback: weights too large to keep resident (or forced) ----
    TK = _pick_k_tile(D)
    wblock_bytes = 2 * 2 * (D * TK + TK * D) * wbytes          # W1/W2 k-blocks, 2-buf
    per_row = 2 * 2 * D * xbytes + D * 4                       # x+out 2-buf + f32 acc
    TB = _pick_batch_tile(B, per_row, budget - wblock_bytes - 2 * (2 * D * 4))
    grid = (pl.cdiv(B, TB), D // TK)
    return pl.pallas_call(
        _residual_block_kernel_stream_k,
        out_shape=jax.ShapeDtypeStruct((B, D), x.dtype),
        grid_spec=pltpu.PrefetchScalarGridSpec(
            num_scalar_prefetch=0,
            grid=grid,
            in_specs=[
                pl.BlockSpec((TB, D), lambda i, k: (i, 0)),    # x tile (revisited over k)
                pl.BlockSpec((D, TK), lambda i, k: (0, k)),    # W1^T column block
                pl.BlockSpec((1, TK), lambda i, k: (0, k)),    # b1 slice
                pl.BlockSpec((TK, D), lambda i, k: (k, 0)),    # W2^T row block
                pl.BlockSpec((1, D), lambda i, k: (0, 0)),     # b2
            ],
            out_specs=pl.BlockSpec((TB, D), lambda i, k: (i, 0)),
            scratch_shapes=[pltpu.VMEM((TB, D), jnp.float32)],
        ),
        compiler_params=pltpu.CompilerParams(
            dimension_semantics=("parallel", "arbitrary"),
            vmem_limit_bytes=vmem_limit,
        ),
        cost_estimate=cost,
    )(x, w1_t, b1_r, w2_t, b2_r)


# ----------------------------------------------------------------------------- reference
def _reference(x, w1, b1, w2, b2):
    """Plain-JAX f32 reference replicating the PyTorch forward."""
    def swish(z):
        return jax.nn.sigmoid(z) * z
    h = x @ w1.T + b1
    h = swish(h)
    h = h @ w2.T + b2
    return swish(x + h)


def _make_params(key, D):
    k1, k2, k3, k4 = jax.random.split(key, 4)
    bound = 1.0 / (D ** 0.5)
    w1 = jax.random.uniform(k1, (D, D), jnp.float32, -bound, bound)
    b1 = jax.random.uniform(k2, (D,), jnp.float32, -bound, bound)
    w2 = jax.random.uniform(k3, (D, D), jnp.float32, -bound, bound)
    b2 = jax.random.uniform(k4, (D,), jnp.float32, -bound, bound)
    return w1, b1, w2, b2


if __name__ == "__main__":
    key = jax.random.PRNGKey(0)
    k_main, k_stream = jax.random.split(key, 2)

    # ---- main path: D=128 (lane-dense), B=256 -> two 128-row batch tiles ----
    B, D = 256, 128
    kx, kp = jax.random.split(k_main, 2)
    x = jax.random.normal(kx, (B, D), dtype=jnp.float32)
    w1, b1, w2, b2 = _make_params(kp, D)
    w1_t, b1_r, w2_t, b2_r = prepare_params(w1, b1, w2, b2)
    ref = _reference(x, w1, b1, w2, b2)

    out = jax.block_until_ready(residual_block(x, w1_t, b1_r, w2_t, b2_r))
    assert out.shape == (B, D) and out.dtype == x.dtype
    assert jnp.allclose(out, ref, atol=2e-2, rtol=2e-2), "f32-I/O mismatch vs reference"

    # ---- bf16 I/O path (halves streamed HBM bytes; kernel is bandwidth bound) ----
    x_bf16 = x.astype(jnp.bfloat16)
    out_bf16 = jax.block_until_ready(residual_block(x_bf16, w1_t, b1_r, w2_t, b2_r))
    assert out_bf16.dtype == jnp.bfloat16
    assert jnp.allclose(out_bf16.astype(jnp.float32), ref, atol=8e-2, rtol=8e-2), \
        "bf16-I/O mismatch vs reference"

    # ---- streamed-K fallback (auto-selected for large D; forced here to verify) ----
    B2, D2 = 128, 256
    kx2, kp2 = jax.random.split(k_stream, 2)
    x2 = jax.random.normal(kx2, (B2, D2), dtype=jnp.float32)
    w1b, b1b, w2b, b2b = _make_params(kp2, D2)
    w1b_t, b1b_r, w2b_t, b2b_r = prepare_params(w1b, b1b, w2b, b2b)
    ref2 = _reference(x2, w1b, b1b, w2b, b2b)

    out2 = jax.block_until_ready(
        residual_block(x2, w1b_t, b1b_r, w2b_t, b2b_r, force_stream_k=True))
    assert out2.shape == (B2, D2) and out2.dtype == x2.dtype
    assert jnp.allclose(out2, ref2, atol=3e-2, rtol=3e-2), "stream-K mismatch vs reference"

    print("KERNEL_OK")
</pallas_src>

<mosaic_0001>
module attributes {stable_mosaic.version = 11 : i64} {
  func.func @_residual_block_kernel(%arg0: i32, %arg1: memref<128x128xf32, #tpu.memory_space<vmem>>, %arg2: memref<128x128xbf16, #tpu.memory_space<vmem>>, %arg3: memref<1x128xf32, #tpu.memory_space<vmem>>, %arg4: memref<128x128xbf16, #tpu.memory_space<vmem>>, %arg5: memref<1x128xf32, #tpu.memory_space<vmem>>, %arg6: memref<128x128xf32, #tpu.memory_space<vmem>>) attributes {dimension_semantics = [#tpu.dimension_semantics<parallel>], iteration_bounds = array<i64: 2>, scalar_prefetch = 0 : i64, scratch_operands = 0 : i64, tpu.core_type = #tpu.core_type<tc>, window_params = [{transform_indices = @transform_0, window_bounds = array<i64: 128, 128>}, {pipeline_mode = #tpu.pipeline_mode<synchronous>, transform_indices = @transform_1, window_bounds = array<i64: 128, 128>}, {pipeline_mode = #tpu.pipeline_mode<synchronous>, transform_indices = @transform_2, window_bounds = array<i64: 1, 128>}, {pipeline_mode = #tpu.pipeline_mode<synchronous>, transform_indices = @transform_3, window_bounds = array<i64: 128, 128>}, {pipeline_mode = #tpu.pipeline_mode<synchronous>, transform_indices = @transform_4, window_bounds = array<i64: 1, 128>}, {transform_indices = @transform_5, window_bounds = array<i64: 128, 128>}]} {
    %c0 = arith.constant 0 : index
    %c0_0 = arith.constant 0 : index
    %0 = vector.load %arg1[%c0, %c0_0] : memref<128x128xf32, #tpu.memory_space<vmem>>, vector<128x128xf32>
    %1 = arith.truncf %0 : vector<128x128xf32> to vector<128x128xbf16>
    %c0_1 = arith.constant 0 : index
    %c0_2 = arith.constant 0 : index
    %2 = vector.load %arg2[%c0_1, %c0_2] : memref<128x128xbf16, #tpu.memory_space<vmem>>, vector<128x128xbf16>
    %cst = arith.constant dense<0.000000e+00> : vector<128x128xf32>
    %3 = tpu.matmul %1, %2, %cst {dimension_numbers = #tpu.dot_dimension_numbers<[1], [0], [0], [1], [0, 0, 1, 1], [], []>} : vector<128x128xbf16>, vector<128x128xbf16>, vector<128x128xf32> -> vector<128x128xf32>
    %c0_3 = arith.constant 0 : index
    %c0_4 = arith.constant 0 : index
    %4 = vector.load %arg3[%c0_3, %c0_4] : memref<1x128xf32, #tpu.memory_space<vmem>>, vector<1x128xf32>
    %5 = vector.broadcast %4 : vector<1x128xf32> to vector<128x128xf32>
    %6 = arith.addf %3, %5 : vector<128x128xf32>
    %cst_5 = arith.constant 5.000000e-01 : f32
    %7 = vector.broadcast %cst_5 : f32 to vector<128x128xf32>
    %8 = arith.mulf %7, %6 : vector<128x128xf32>
    %cst_6 = arith.constant 5.000000e-01 : f32
    %9 = vector.broadcast %cst_6 : f32 to vector<128x128xf32>
    %10 = arith.mulf %9, %6 : vector<128x128xf32>
    %11 = math.tanh %10 : vector<128x128xf32>
    %cst_7 = arith.constant 1.000000e+00 : f32
    %12 = vector.broadcast %cst_7 : f32 to vector<128x128xf32>
    %13 = arith.addf %12, %11 : vector<128x128xf32>
    %14 = arith.mulf %8, %13 : vector<128x128xf32>
    %15 = arith.truncf %14 : vector<128x128xf32> to vector<128x128xbf16>
    %c0_8 = arith.constant 0 : index
    %c0_9 = arith.constant 0 : index
    %16 = vector.load %arg4[%c0_8, %c0_9] : memref<128x128xbf16, #tpu.memory_space<vmem>>, vector<128x128xbf16>
    %cst_10 = arith.constant dense<0.000000e+00> : vector<128x128xf32>
    %17 = tpu.matmul %15, %16, %cst_10 {dimension_numbers = #tpu.dot_dimension_numbers<[1], [0], [0], [1], [0, 0, 1, 1], [], []>} : vector<128x128xbf16>, vector<128x128xbf16>, vector<128x128xf32> -> vector<128x128xf32>
    %c0_11 = arith.constant 0 : index
    %c0_12 = arith.constant 0 : index
    %18 = vector.load %arg5[%c0_11, %c0_12] : memref<1x128xf32, #tpu.memory_space<vmem>>, vector<1x128xf32>
    %19 = vector.broadcast %18 : vector<1x128xf32> to vector<128x128xf32>
    %20 = arith.addf %17, %19 : vector<128x128xf32>
    %c0_13 = arith.constant 0 : index
    %c0_14 = arith.constant 0 : index
    %21 = vector.load %arg1[%c0_13, %c0_14] : memref<128x128xf32, #tpu.memory_space<vmem>>, vector<128x128xf32>
    %22 = arith.addf %21, %20 : vector<128x128xf32>
    %cst_15 = arith.constant 5.000000e-01 : f32
    %23 = vector.broadcast %cst_15 : f32 to vector<128x128xf32>
    %24 = arith.mulf %23, %22 : vector<128x128xf32>
    %cst_16 = arith.constant 5.000000e-01 : f32
    %25 = vector.broadcast %cst_16 : f32 to vector<128x128xf32>
    %26 = arith.mulf %25, %22 : vector<128x128xf32>
    %27 = math.tanh %26 : vector<128x128xf32>
    %cst_17 = arith.constant 1.000000e+00 : f32
    %28 = vector.broadcast %cst_17 : f32 to vector<128x128xf32>
    %29 = arith.addf %28, %27 : vector<128x128xf32>
    %30 = arith.mulf %24, %29 : vector<128x128xf32>
    %c0_18 = arith.constant 0 : index
    %c0_19 = arith.constant 0 : index
    %31 = vector.load %arg6[%c0_18, %c0_19] : memref<128x128xf32, #tpu.memory_space<vmem>>, vector<128x128xf32>
    tpu.vector_store %arg6[%c0_18, %c0_19], %30 {strides = array<i32>} : memref<128x128xf32, #tpu.memory_space<vmem>>, vector<128x128xf32>,
    return
  }
  func.func @transform_0(%arg0: i32) -> (i32, i32) {
    %c0_i32 = arith.constant 0 : i32
    %c0_i32_0 = arith.constant 0 : i32
    return %arg0, %c0_i32 : i32, i32
  }
  func.func @transform_1(%arg0: i32) -> (i32, i32) {
    %c0_i32 = arith.constant 0 : i32
    %c0_i32_0 = arith.constant 0 : i32
    %c0_i32_1 = arith.constant 0 : i32
    return %c0_i32, %c0_i32_0 : i32, i32
  }
  func.func @transform_2(%arg0: i32) -> (i32, i32) {
    %c0_i32 = arith.constant 0 : i32
    %c0_i32_0 = arith.constant 0 : i32
    %c0_i32_1 = arith.constant 0 : i32
    return %c0_i32, %c0_i32_0 : i32, i32
  }
  func.func @transform_3(%arg0: i32) -> (i32, i32) {
    %c0_i32 = arith.constant 0 : i32
    %c0_i32_0 = arith.constant 0 : i32
    %c0_i32_1 = arith.constant 0 : i32
    return %c0_i32, %c0_i32_0 : i32, i32
  }
  func.func @transform_4(%arg0: i32) -> (i32, i32) {
    %c0_i32 = arith.constant 0 : i32
    %c0_i32_0 = arith.constant 0 : i32
    %c0_i32_1 = arith.constant 0 : i32
    return %c0_i32, %c0_i32_0 : i32, i32
  }
  func.func @transform_5(%arg0: i32) -> (i32, i32) {
    %c0_i32 = arith.constant 0 : i32
    %c0_i32_0 = arith.constant 0 : i32
    return %arg0, %c0_i32 : i32, i32
  }
}

</mosaic_0001>

<bundles_post_ra>
// kernel: residual_block.1
= control target key start
LH: loop header
LB: loop body
LE: loop exit
PB: predicated region body
PF: predicated region fallthrough
CT: control target
= control target key end

     0   :  { %10 = vsyncpa [#allocation3], 0  ;;  %s1761_s0 = inlined_call_operand.hbm [shape: f32[256,128], index: 0, kind: input, shape index: {}]   ;;  %s1762_s1 = inlined_call_operand.hbm [shape: bf16[128,128], index: 1, kind: input, shape index: {}]   ;;  %s1763_s2 = inlined_call_operand.vmem [shape: f32[1,128], index: 2, kind: input, shape index: {}]   ;;  %s1764_s3 = inlined_call_operand.hbm [shape: bf16[128,128], index: 3, kind: input, shape index: {}]   ;;  %s1765_s4 = inlined_call_operand.vmem [shape: f32[1,128], index: 4, kind: input, shape index: {}]   ;;  %s1766_s5 = inlined_call_operand.hbm [shape: f32[256,128], index: 5, kind: output, shape index: {}]  }
   0x1   :  { %12 = vsyncpa [#allocation3 + $0x1], 0 }
   0x2   :  { %13 = vsyncpa [#allocation6], 0 }
   0x3   :  { %14 = vsyncpa [#allocation4], 0 }
   0x4   :  { %16 = vsyncpa [#allocation4 + $0x1], 0  ;;  %s1386_s18 = smov 0   ;;  %s1388_s19 = smov 0  }
   0x5   :  { %s1390_s20 = smov 0   ;;  %s1392_s21 = smov 0  }
   0x6 LB: > { %s1407_s22 = sadd.s32 4294967295, %s1344_s21   ;;  %s909_s23 = sadd.s32 4294967294, %s1344_s21   ;;  %s1344_s21 = sphi %s1392_s21, %s1788_s21   ;;  %s1340_s20 = sphi %s1390_s20, %s1787_s20   ;;  %s1336_s19 = sphi %s1388_s19, %s1786_s19   ;;  %s1332_s18 = sphi %s1386_s18, %s1785_s18  }
   0x7   : > { %p42_p0 = scmp.ne.s32.totalorder %s1336_s19, %s1332_s18  ;;  %p1767_p1 = scmp.eq.s32.totalorder %s1407_s22, 0 }
   0x8   : > { %p156_p3 = scmp.eq.s32.totalorder %s909_s23, 1  ;;  %p910_p5 = scmp.ge.s32.totalorder %s1344_s21, 1 }
   0x9   : > { %p1416_p4 = por %p1767_p1, %p42_p0  ;;  %p163_p7 = scmp.lt.s32.totalorder %s1344_s21, 3 }
   0xa   : > { %p1421_p6 = por %p156_p3, %p42_p0  ;;  %s1346_s27 = smov [#allocation5]  }
   0xb   : > { %s1771_s24 = scalar_select %p1416_p4, 1, 0 }
   0xc   : > { %s1772_s25 = scalar_select %p1421_p6, 1, 0 }
   0xd   : > { %p1426_p8 = pnand %p910_p5, %p163_p7  ;;  %s175_s28 = sshll.u32 %s1346_s27, 4  ;;  %s176_s28 = int_to_ptr.vmem [resolvable:$true] %s175_s28 }
   0xe   : > { %s1347_s30 = smov [#allocation7]   ;;  %s1207_s7 = scalar_lea.vmem %s176_s28, 1024 }
   0xf   : > { %s1773_s26 = scalar_select %p1426_p8, 1, 0 }
  0x10   : > { %p1055_p9 = pneg %p1426_p8  ;;  %s191_s6 = sshll.u32 %s1347_s30, 4  ;;  %s192_s6 = int_to_ptr.vmem [resolvable:$true] %s191_s6 }
  0x11   : > { %p1208_p13 = scmp.ne.s32.totalorder %s176_s28, %s1207_s7  ;;  %p1215_p5 = scmp.lt.s32.totalorder %s176_s28, %s176_s28 }
  0x12   : > { %p1435_p11 = pnand %p1055_p9, %p1767_p1  ;;  %p1216_p7 = scmp.lt.s32.totalorder %s1207_s7, %s1207_s7 }
  0x14   : > { %p1198_p12 = pneg %p1435_p11  ;;  %p1217_p10 = por %p1216_p7, %p1215_p5 }
  0x16   : > { %p1210_p0 = pnand %p1208_p13, %p1198_p12 }
  0x18   : > { %p1211_p3 = pneg %p1210_p0 }
  0x1a   : > { %p1218_p9 = pnand %p1217_p10, %p1211_p3 }
  0x1c   : > { %1221 = shalt.err (!%p1218_p9)
}
  0x1d   : > { %s1348_s8 = smov 64   ;;  %s1349_s9 = smov 4  }
  0x1e   : > { %1058 = dma.hbm_to_vmem [thread:$0]  (!%p1435_p11), %s1762_s1, 1024, %s176_s28, [#allocation6], %s1348_s8, %s1348_s8, %s1349_s9  }
  0x1f   : > { %s1233_s12 = scalar_lea.vmem %s192_s6, 1024  ;;  %p1241_p2 = scmp.lt.s32.totalorder %s192_s6, %s192_s6 }
  0x20   : > { %p1234_p1 = scmp.ne.s32.totalorder %s192_s6, %s1233_s12  ;;  %p1242_p6 = scmp.lt.s32.totalorder %s1233_s12, %s1233_s12 }
  0x22   : > { %p1236_p13 = pnand %p1234_p1, %p1198_p12  ;;  %p1243_p5 = por %p1242_p6, %p1241_p2 }
  0x24   : > { %p1237_p0 = pneg %p1236_p13 }
  0x26   : > { %p1244_p10 = pnand %p1243_p5, %p1237_p0 }
  0x28   : > { %1247 = shalt.err (!%p1244_p10)
}
  0x29   : > { %1061 = dma.hbm_to_vmem [thread:$0]  (!%p1435_p11), %s1764_s3, 1024, %s192_s6, [#allocation6], %s1348_s8, %s1348_s8, %s1349_s9  }
  0x2a   : > { %s1458_s15 = sadd.s32 1, %s1344_s21   ;;  %s29_s16 = sadd.s32 1, %s1340_s20 }
  0x2b   : > { %s26_s17 = ssub.s32 %s1344_s21, %s1458_s15  ;;  %p36_p1 = scmp.ne.s32.totalorder %s1340_s20, %s1336_s19 }
  0x2c   : > { %p27_p2 = scmp.eq.s32.totalorder %s26_s17, 0  ;;  %p37_p6 = scmp.eq.s32.totalorder %s1344_s21, 0 }
  0x2d   : > { %p1775_p12 = scmp.eq.s32.totalorder %s1407_s22, 1  ;;  %p1072_p7 = scmp.lt.s32.totalorder %s1344_s21, 2 }
  0x2e   : > { %s1474_s27 = scalar_select %p27_p2, %s1340_s20, %s29_s16  }
  0x2f   : > { %p1468_p3 = por %p1775_p12, %p36_p1  ;;  %p38_p9 = por %p37_p6, %p36_p1 }
  0x30   : > { %s208_s28 = sand.u32 1, %s1340_s20   ;;  %s945_s30 = sshll.u32 %s1344_s21, 11 }
  0x31   : > { %s1776_s23 = scalar_select %p1468_p3, 1, 0 }
  0x32   : > { %s914_s29 = sshll.u32 %s208_s28, 7  ;;  %s1481_s8 = scalar_lea.hbm %s1761_s0, %s945_s30 }
  0x33   : > { %s212_s9 = scalar_lea.vmem [#allocation2], %s914_s29  ;;  %p1485_p11 = pnand %p1072_p7, %p38_p9 }
  0x34   : > { %s219_s10 = sshll.u32 %s212_s9, 4  ;;  %s1489_s12 = scalar_lea.sflag [#allocation3], %s208_s28  ;;  %s1483_s10 = int_to_ptr.vmem [resolvable:$true] %s219_s10 }
  0x35   : > { %s1248_s13 = scalar_lea.hbm %s1481_s8, 2048  ;;  %p1250_p0 = pneg %p1485_p11 }
  0x36   : > { %p1249_p13 = scmp.ne.s32.totalorder %s1481_s8, %s1248_s13  ;;  %s1253_s17 = scalar_lea.hbm %s1761_s0, 4096 }
  0x37   : > { %p1254_p1 = scmp.lt.s32.totalorder %s1481_s8, %s1761_s0  ;;  %p1255_p2 = scmp.lt.s32.totalorder %s1253_s17, %s1248_s13 }
  0x38   : > { %p1251_p5 = pnand %p1250_p0, %p1249_p13 }
  0x39   : > { %p1256_p6 = por %p1255_p2, %p1254_p1 }
  0x3a   : > { %p1252_p10 = pneg %p1251_p5 }
  0x3c   : > { %p1257_p12 = pnand %p1256_p6, %p1252_p10 }
  0x3e   : > { %1260 = shalt.err (!%p1257_p12)
}
  0x3f   : > { %s1261_s28 = scalar_lea.vmem %s1483_s10, 2048  ;;  %s1350_s6 = smov [#allocation2]  }
  0x40   : > { %p1262_p7 = scmp.ne.s32.totalorder %s1483_s10, %s1261_s28  ;;  %s1266_s7 = sshll.u32 %s1350_s6, 4  ;;  %s1267_s7 = int_to_ptr.vmem [resolvable:$false] %s1266_s7 }
  0x41   : > { %s1268_s9 = scalar_lea.vmem %s1267_s7, 4096  ;;  %p1269_p5 = scmp.lt.s32.totalorder %s1483_s10, %s1267_s7 }
  0x42   : > { %p1264_p9 = pnand %p1262_p7, %p1250_p0  ;;  %p1270_p3 = scmp.lt.s32.totalorder %s1268_s9, %s1261_s28 }
  0x44   : > { %p1265_p13 = pneg %p1264_p9  ;;  %p1271_p4 = por %p1270_p3, %p1269_p5 }
  0x46   : > { %p1272_p8 = pnand %p1271_p4, %p1265_p13 }
  0x48   : > { %1275 = shalt.err (!%p1272_p8)
}
  0x49   : > { %s1351_s13 = smov 128   ;;  %s1352_s14 = smov 8  }
  0x4a   : > { %1065 = dma.hbm_to_vmem [thread:$0]  (!%p1485_p11), %s1481_s8, 2048, %s1483_s10, %s1489_s12, %s1351_s13, %s1351_s13, %s1352_s14  }
  0x4b   : > { %p1778_p0 = scmp.ne.s32.totalorder %s1773_s26, 0 }
  0x4c   : > { %s1513_s16 = sand.u32 (!%p1778_p0), 1, %s1336_s19   ;;  %p1779_p4 = scmp.ne.s32.totalorder (!%p1778_p0), %s1771_s24, 0 }
  0x4d   : > { %231 = sbr.rel (%p1778_p0) target bundleno = 606 (0x25e), region = 40  ;;  %s918_s17 = sshll.u32 (!%p1778_p0), %s1513_s16, 7 }
  0x4e   : > { %s234_s29 = scalar_lea.sflag (!%p1778_p0), [#allocation3], %s1513_s16  ;;  %s1519_s30 = scalar_lea.vmem (!%p1778_p0), [#allocation2], %s918_s17 }
  0x52   : > { %1319 = dma.done.wait (%p1779_p4), %s234_s29, 2048  }
  0x53   : > { %1321 = vsyncadd (%p1779_p4), %s234_s29, 4294965248  ;;  %p1780_p8 = scmp.eq.s32.totalorder %s1407_s22, 0 }
  0x55   : > { %1323 = dma.done.wait (%p1780_p8), [#allocation6], 2048   ;;  %p1781_p3 = pmov %p1780_p8 }
  0x56   : > { %v1116_v0 = vld [vmem:[#allocation5 + $0x38] sm:$0xff]   ;;  %v1117_v1 = vld [vmem:[#allocation5 + $0x30] sm:$0xff]   ;;  %v1118_v2 = vld [vmem:[#allocation5 + $0x28] sm:$0xff]   ;;  %s1677_s11 = scalar_lea.vmem [#allocation8], %s918_s17  ;;  %s946_s12 = sshll.u32 %s1407_s22, 11 }
  0x57   : > { %1325 = vsyncadd (%p1781_p3), [#allocation6], 4294965248  ;;  %979 = vmatprep.subr.bf16.mxu0 %v1116_v0  ;;  %v1119_v3 = vld [vmem:[#allocation5 + $0x20] sm:$0xff]   ;;  %v1533_v5 = vld [vmem:[%s1519_s30 + $0x8] sm:$0xff]  ;;  %s817_s28 = sshll.u32 %s1677_s11, 4  ;;  %s1714_s9 = scalar_lea.hbm %s1766_s5, %s946_s12  ;;  %s1716_s28 = int_to_ptr.vmem [resolvable:$true] %s817_s28 }
  0x58   : > { %980 = vmatpush3.bf16.msra.mxu0 %v1116_v0  ;;  %v1530_v4 = vld [vmem:[%s1519_s30] sm:$0xff]  ;;  %v1120_v7 = vld [vmem:[#allocation5 + $0x18] sm:$0xff]   ;;  %v1121_v8 = vld [vmem:[#allocation5 + $0x10] sm:$0xff]   ;;  %s804_s13 = scalar_lea.sflag [#allocation4], %s1513_s16  ;;  %s1276_s22 = scalar_lea.vmem %s1716_s28, 2048 }
  0x59   : > { %981 = vmatprep.subr.bf16.mxu0 %v1117_v1  ;;  %v291_v6 = vpack.c.bf16 %v1533_v5, %v1530_v4  ;;  %v1122_v9 = vld [vmem:[#allocation5 + $0x8] sm:$0xff]   ;;  %v1123_v10 = vld [vmem:[#allocation5] sm:$0xff]   ;;  %v1538_v11 = vld [vmem:[%s1519_s30 + $0x10] sm:$0xff]  ;;  %p1277_p11 = scmp.ne.s32.totalorder %s1716_s28, %s1276_s22  ;;  %p1782_p10 = scmp.ne.s32.totalorder %s1776_s23, 0 }
  0x5a   : > { %v1541_v12 = vld [vmem:[%s1519_s30 + $0x18] sm:$0xff]  ;;  %v1544_v13 = vld [vmem:[%s1519_s30 + $0x20] sm:$0xff]  ;;  %v1547_v14 = vld [vmem:[%s1519_s30 + $0x28] sm:$0xff]  ;;  %s1353_s14 = smov [#allocation8]  }
  0x5b   : > { %995 = vmatprep.mubr.bf16.mxu0 %v291_v6  ;;  %v292_v15 = vpack.c.bf16 %v1541_v12, %v1538_v11  ;;  %v293_v16 = vpack.c.bf16 %v1547_v14, %v1544_v13  ;;  %v1554_v17 = vld [vmem:[%s1519_s30 + $0x30] sm:$0xff]  ;;  %v1557_v18 = vld [vmem:[%s1519_s30 + $0x38] sm:$0xff]  ;;  %v1560_v19 = vld [vmem:[%s1519_s30 + $0x40] sm:$0xff]  ;;  %p1278_p1 = pnand %p1277_p11, %p1782_p10  ;;  %s1280_s17 = sshll.u32 %s1353_s14, 4  ;;  %s1281_s17 = int_to_ptr.vmem [resolvable:$false] %s1280_s17 }
  0x5c   : > { %982 = vmatpush3.bf16.msra.mxu0 %v1117_v1  ;;  %v1563_v20 = vld [vmem:[%s1519_s30 + $0x48] sm:$0xff]  ;;  %v294_v21 = vpack.c.bf16 %v1557_v18, %v1554_v17  ;;  %v1570_v23 = vld [vmem:[%s1519_s30 + $0x50] sm:$0xff]  ;;  %v1573_v24 = vld [vmem:[%s1519_s30 + $0x58] sm:$0xff]  ;;  %s1282_s29 = scalar_lea.vmem %s1281_s17, 4096  ;;  %p1283_p6 = scmp.lt.s32.totalorder %s1716_s28, %s1281_s17 }
  0x5d   : > { %983 = vmatprep.subr.bf16.mxu0 %v1118_v2  ;;  %v295_v22 = vpack.c.bf16 %v1563_v20, %v1560_v19  ;;  %v1576_v25 = vld [vmem:[%s1519_s30 + $0x60] sm:$0xff]  ;;  %v1579_v26 = vld [vmem:[%s1519_s30 + $0x68] sm:$0xff]  ;;  %v296_v27 = vpack.c.bf16 %v1573_v24, %v1570_v23  ;;  %v1586_v29 = vld [vmem:[%s1519_s30 + $0x70] sm:$0xff]  ;;  %p1279_p2 = pneg %p1278_p1  ;;  %p1284_p12 = scmp.lt.s32.totalorder %s1282_s29, %s1276_s22 }
  0x5e   : > { %v297_v28 = vpack.c.bf16 %v1579_v26, %v1576_v25  ;;  %v1589_v30 = vld [vmem:[%s1519_s30 + $0x78] sm:$0xff]  ;;  %v1125_v33 = vld [vmem:[#allocation7 + $0x30] sm:$0xff]   ;;  %v1126_v34 = vld [vmem:[#allocation7 + $0x28] sm:$0xff]  }
  0x5f   : > { %v298_v31 = vpack.c.bf16 %v1589_v30, %v1586_v29  ;;  %v1124_v32 = vld [vmem:[#allocation7 + $0x38] sm:$0xff]   ;;  %v1127_v35 = vld [vmem:[#allocation7 + $0x20] sm:$0xff]   ;;  %v1129_v37 = vld [vmem:[#allocation7 + $0x10] sm:$0xff]   ;;  %p1285_p7 = por %p1284_p12, %p1283_p6 }
  0x60   : > { %984 = vmatpush3.bf16.msra.mxu0 %v1118_v2  ;;  %1011 = vmatprep.subr.bf16.mxu1 %v1124_v32  ;;  %v1128_v36 = vld [vmem:[#allocation7 + $0x18] sm:$0xff]   ;;  %v1130_v38 = vld [vmem:[#allocation7 + $0x8] sm:$0xff]   ;;  %v1131_v39 = vld [vmem:[#allocation7] sm:$0xff]  }
  0x61   : > { %985 = vmatprep.subr.bf16.mxu0 %v1119_v3  ;;  %1012 = vmatpush3.bf16.msra.mxu1 %v1124_v32  ;;  %v1596_v40 = vld [vmem:[%s1763_s2] ss:$0 sm:$0xff]  ;;  %p1286_p9 = pnand %p1285_p7, %p1279_p2 }
  0x62   : > { %1013 = vmatprep.subr.bf16.mxu1 %v1125_v33 }
  0x64   : > { %986 = vmatpush3.bf16.msra.mxu0 %v1119_v3 }
  0x65   : > { %987 = vmatprep.subr.bf16.mxu0 %v1120_v7  ;;  %1014 = vmatpush3.bf16.msra.mxu1 %v1125_v33 }
  0x66   : > { %1015 = vmatprep.subr.bf16.mxu1 %v1126_v34 }
  0x68   : > { %988 = vmatpush3.bf16.msra.mxu0 %v1120_v7 }
  0x69   : > { %989 = vmatprep.subr.bf16.mxu0 %v1121_v8  ;;  %1016 = vmatpush3.bf16.msra.mxu1 %v1126_v34 }
  0x6a   : > { %1017 = vmatprep.subr.bf16.mxu1 %v1127_v35 }
  0x6c   : > { %990 = vmatpush3.bf16.msra.mxu0 %v1121_v8 }
  0x6d   : > { %991 = vmatprep.subr.bf16.mxu0 %v1122_v9  ;;  %1018 = vmatpush3.bf16.msra.mxu1 %v1127_v35 }
  0x6e   : > { %1019 = vmatprep.subr.bf16.mxu1 %v1128_v36 }
  0x70   : > { %992 = vmatpush3.bf16.msra.mxu0 %v1122_v9 }
  0x71   : > { %993 = vmatprep.subr.bf16.mxu0 %v1123_v10  ;;  %1020 = vmatpush3.bf16.msra.mxu1 %v1128_v36 }
  0x72   : > { %1021 = vmatprep.subr.bf16.mxu1 %v1129_v37 }
  0x74   : > { %994 = vmatpush3.bf16.msra.mxu0 %v1123_v10 }
  0x75   : > { %1022 = vmatpush3.bf16.msra.mxu1 %v1129_v37 }
  0x76   : > { %1023 = vmatprep.subr.bf16.mxu1 %v1130_v38 }
  0x77   : > { %996 = vmatmul.mubr.bf16.vlgmr.msra.gmra.mxu0 %v292_v15 }
  0x78   : > { %999 = vmatprep.mubr.bf16.mxu0 %v293_v16 }
  0x79   : > { %1024 = vmatpush3.bf16.msra.mxu1 %v1130_v38 }
  0x7a   : > { %1025 = vmatprep.subr.bf16.mxu1 %v1131_v39 }
  0x7d   : > { %1026 = vmatpush3.bf16.msra.mxu1 %v1131_v39 }
  0x7f   : > { %1000 = vmatmul.mubr.bf16.gmra.mxu0 %v294_v21 }
  0x80   : > { %1003 = vmatprep.mubr.bf16.mxu0 %v295_v22 }
  0x87   : > { %1004 = vmatmul.mubr.bf16.gmra.mxu0 %v296_v27 }
  0x88   : > { %1007 = vmatprep.mubr.bf16.mxu0 %v297_v28 }
  0x8f   : > { %1008 = vmatmul.mubr.bf16.gmra.mxu0 %v298_v31 }
 0x137   : > { %v997_v41 = vpop.f32.mrf.mxu0 }
 0x138   : > { %v413_v42 = vadd.f32 %v997_v41, %v1596_v40 }
 0x139   : > { %v404_v43 = vpop.f32.mrf.mxu0 }
 0x13a   : > { %v469_v44 = vmul.f32 0.5, %v413_v42  ;;  %v405_v45 = vadd.f32 %v1596_v40, %v404_v43 }
 0x13b   : > { %v998_v46 = vpop.f32.mrf.mxu0 }
 0x13c   : > { %v467_v47 = vmul.f32 0.5, %v405_v45  ;;  %v416_v48 = vadd.f32 %v998_v46, %v1596_v40  ;;  %1132 = vtanh.f32 %v469_v44 }
 0x13d   : > { %v407_v49 = vpop.f32.mrf.mxu0 }
 0x13e   : > { %v470_v50 = vmul.f32 0.5, %v416_v48  ;;  %v408_v51 = vadd.f32 %v1596_v40, %v407_v49  ;;  %1134 = vtanh.f32 %v467_v47 }
 0x13f   : > { %v1001_v52 = vpop.f32.mrf.mxu0 }
 0x140   : > { %1136 = vtanh.f32 %v470_v50  ;;  %v468_v53 = vmul.f32 0.5, %v408_v51  ;;  %v429_v54 = vadd.f32 %v1001_v52, %v1596_v40 }
 0x141   : > { %v420_v55 = vpop.f32.mrf.mxu0 }
 0x142   : > { %1138 = vtanh.f32 %v468_v53  ;;  %v421_v56 = vadd.f32 %v1596_v40, %v420_v55  ;;  %v1604_v57 = vmul.f32 0.5, %v429_v54 }
 0x143   : > { %v1002_v58 = vpop.f32.mrf.mxu0 }
 0x144   : > { %v1606_v59 = vmul.f32 0.5, %v421_v56  ;;  %v432_v60 = vadd.f32 %v1002_v58, %v1596_v40 }
 0x145   : > { %v423_v61 = vpop.f32.mrf.mxu0 }
 0x146   : > { %1140 = vtanh.f32 %v1606_v59  ;;  %v474_v62 = vmul.f32 0.5, %v432_v60  ;;  %v424_v63 = vadd.f32 %v1596_v40, %v423_v61 }
 0x147   : > { %1142 = vtanh.f32 %v1604_v57  ;;  %v1005_v0 = vpop.f32.mrf.mxu0 }
 0x148   : > { %1144 = vtanh.f32 %v474_v62  ;;  %v472_v1 = vmul.f32 0.5, %v424_v63  ;;  %v445_v2 = vadd.f32 %v1005_v0, %v1596_v40 }
 0x149   : > { %v436_v3 = vpop.f32.mrf.mxu0  ;;  %v1133_v7 = vpop.eup %1132 }
 0x14a   : > { %1146 = vtanh.f32 %v472_v1  ;;  %v437_v6 = vadd.f32 %v1596_v40, %v436_v3  ;;  %v1614_v8 = vmul.f32 0.5, %v445_v2  ;;  %v501_v33 = vadd.f32 1.0, %v1133_v7 }
 0x14b   : > { %v1006_v9 = vpop.f32.mrf.mxu0  ;;  %v1135_v10 = vpop.eup %1134 }
 0x14c   : > { %v1616_v15 = vmul.f32 0.5, %v437_v6  ;;  %v448_v16 = vadd.f32 %v1006_v9, %v1596_v40  ;;  %v499_v35 = vadd.f32 1.0, %v1135_v10  ;;  %v517_v45 = vmul.f32 %v501_v33, %v469_v44 }
 0x14d   : > { %v1137_v21 = vpop.eup %1136  ;;  %v439_v22 = vpop.f32.mrf.mxu0 }
 0x14e   : > { %v502_v27 = vadd.f32 1.0, %v1137_v21  ;;  %1148 = vtanh.f32 %v1616_v15  ;;  %v478_v28 = vmul.f32 0.5, %v448_v16  ;;  %v440_v31 = vadd.f32 %v1596_v40, %v439_v22 }
 0x14f   : > { %v1139_v32 = vpop.eup %1138  ;;  %1150 = vtanh.f32 %v1614_v8  ;;  %v1009_v34 = vpop.f32.mrf.mxu0  ;;  %v515_v48 = vmul.f32 %v499_v35, %v467_v47 }
 0x150   : > { %1152 = vtanh.f32 %v478_v28  ;;  %v476_v36 = vmul.f32 0.5, %v440_v31  ;;  %v461_v37 = vadd.f32 %v1009_v34, %v1596_v40  ;;  %v518_v38 = vmul.f32 %v502_v27, %v470_v50 }
 0x151   : > { %v452_v39 = vpop.f32.mrf.mxu0  ;;  %v500_v41 = vadd.f32 1.0, %v1139_v32 }
 0x152   : > { %1154 = vtanh.f32 %v476_v36  ;;  %v453_v42 = vadd.f32 %v1596_v40, %v452_v39  ;;  %v481_v52 = vmul.f32 0.5, %v461_v37  ;;  %v532_v61 = vpack.c.bf16 %v518_v38, %v517_v45 }
 0x153   : > { %v1141_v43 = vpop.eup %1140  ;;  %v1010_v46 = vpop.f32.mrf.mxu0  ;;  %v516_v49 = vmul.f32 %v500_v41, %v468_v53 }
 0x154   : > { %v1143_v51 = vpop.eup %1142  ;;  %v479_v54 = vmul.f32 0.5, %v453_v42  ;;  %v464_v56 = vadd.f32 %v1010_v46, %v1596_v40  ;;  %v503_v50 = vadd.f32 1.0, %v1141_v43 }
 0x155   : > { %v1145_v55 = vpop.eup %1144  ;;  %v455_v58 = vpop.f32.mrf.mxu0  ;;  %v531_v60 = vpack.c.bf16 %v516_v49, %v515_v48  ;;  %v505_v44 = vadd.f32 1.0, %v1143_v51 }
 0x156   : > { %v506_v63 = vadd.f32 1.0, %v1145_v55  ;;  %1156 = vtanh.f32 %v479_v54  ;;  %v456_v0 = vadd.f32 %v1596_v40, %v455_v58  ;;  %v482_v3 = vmul.f32 0.5, %v464_v56 }
 0x157   : > { %v1147_v2 = vpop.eup %1146  ;;  %1027 = vmatprep.mubr.bf16.mxu1 %v531_v60  ;;  %1158 = vtanh.f32 %v481_v52  ;;  %v519_v6 = vmul.f32 %v503_v50, %v1606_v59  ;;  %v521_v21 = vmul.f32 %v505_v44, %v1604_v57 }
 0x158   : > { %v504_v47 = vadd.f32 1.0, %v1147_v2  ;;  %v480_v53 = vmul.f32 0.5, %v456_v0  ;;  %1028 = vmatmul.mubr.bf16.vlgmr.msra.gmra.mxu1 %v532_v61  ;;  %1160 = vtanh.f32 %v482_v3  ;;  %v522_v7 = vmul.f32 %v506_v63, %v474_v62 }
 0x15a   : > { %v520_v9 = vmul.f32 %v504_v47, %v472_v1  ;;  %1162 = vtanh.f32 %v480_v53  ;;  %v534_v32 = vpack.c.bf16 %v522_v7, %v521_v21 }
 0x15b   : > { %v1149_v10 = vpop.eup %1148 }
 0x15c   : > { %v1151_v16 = vpop.eup %1150  ;;  %v533_v22 = vpack.c.bf16 %v520_v9, %v519_v6  ;;  %v507_v27 = vadd.f32 1.0, %v1149_v10 }
 0x15d   : > { %v1153_v40 = vpop.eup %1152  ;;  %v509_v34 = vadd.f32 1.0, %v1151_v16 }
 0x15e   : > { %v510_v31 = vadd.f32 1.0, %v1153_v40  ;;  %1031 = vmatprep.mubr.bf16.mxu1 %v533_v22  ;;  %v523_v37 = vmul.f32 %v507_v27, %v1616_v15 }
 0x15f   : > { %v1155_v33 = vpop.eup %1154  ;;  %v525_v38 = vmul.f32 %v509_v34, %v1614_v8  ;;  %v1633_v8 = vld [vmem:[%s1765_s4] ss:$0 sm:$0xff] }
 0x160   : > { %v508_v35 = vadd.f32 1.0, %v1155_v33  ;;  %1032 = vmatmul.mubr.bf16.gmra.mxu1 %v534_v32  ;;  %v526_v59 = vmul.f32 %v510_v31, %v478_v28 }
 0x162   : > { %v524_v62 = vmul.f32 %v508_v35, %v476_v36  ;;  %v536_v43 = vpack.c.bf16 %v526_v59, %v525_v38 }
 0x163   : > { %v1157_v1 = vpop.eup %1156 }
 0x164   : > { %v535_v39 = vpack.c.bf16 %v524_v62, %v523_v37  ;;  %v1159_v41 = vpop.eup %1158  ;;  %v511_v42 = vadd.f32 1.0, %v1157_v1 }
 0x165   : > { %v1161_v57 = vpop.eup %1160  ;;  %v513_v48 = vadd.f32 1.0, %v1159_v41 }
 0x166   : > { %1035 = vmatprep.mubr.bf16.mxu1 %v535_v39  ;;  %v514_v46 = vadd.f32 1.0, %v1161_v57  ;;  %v527_v51 = vmul.f32 %v511_v42, %v479_v54 }
 0x167   : > { %v1163_v45 = vpop.eup %1162  ;;  %v529_v15 = vmul.f32 %v513_v48, %v481_v52 }
 0x168   : > { %v512_v49 = vadd.f32 1.0, %v1163_v45  ;;  %1036 = vmatmul.mubr.bf16.gmra.mxu1 %v536_v43  ;;  %v530_v55 = vmul.f32 %v514_v46, %v482_v3 }
 0x16a   : > { %v528_v56 = vmul.f32 %v512_v49, %v480_v53  ;;  %v538_v36 = vpack.c.bf16 %v530_v55, %v529_v15 }
 0x16c   : > { %v537_v28 = vpack.c.bf16 %v528_v56, %v527_v51 }
 0x16e   : > { %1039 = vmatprep.mubr.bf16.mxu1 %v537_v28 }
 0x170   : > { %1040 = vmatmul.mubr.bf16.gmra.mxu1 %v538_v36 }
 0x218   : > { %v1029_v58 = vpop.f32.mrf.mxu1 }
 0x219   : > { %v653_v60 = vadd.f32 %v1029_v58, %v1633_v8 }
 0x21a   : > { %v644_v61 = vpop.f32.mrf.mxu1 }
 0x21b   : > { %v709_v50 = vadd.f32 %v653_v60, %v1538_v11  ;;  %v645_v54 = vadd.f32 %v1633_v8, %v644_v61 }
 0x21c   : > { %v1030_v63 = vpop.f32.mrf.mxu1 }
 0x21d   : > { %v725_v0 = vmul.f32 0.5, %v709_v50  ;;  %v707_v52 = vadd.f32 %v645_v54, %v1530_v4  ;;  %v656_v2 = vadd.f32 %v1030_v63, %v1633_v8 }
 0x21e   : > { %v647_v3 = vpop.f32.mrf.mxu1 }
 0x21f   : > { %1164 = vtanh.f32 %v725_v0  ;;  %v723_v44 = vmul.f32 0.5, %v707_v52  ;;  %v710_v47 = vadd.f32 %v656_v2, %v1541_v12  ;;  %v648_v53 = vadd.f32 %v1633_v8, %v647_v3 }
 0x220   : > { %v1033_v6 = vpop.f32.mrf.mxu1 }
 0x221   : > { %1166 = vtanh.f32 %v723_v44  ;;  %v726_v7 = vmul.f32 0.5, %v710_v47  ;;  %v708_v11 = vadd.f32 %v648_v53, %v1533_v5  ;;  %v669_v9 = vadd.f32 %v1033_v6, %v1633_v8 }
 0x222   : > { %v660_v10 = vpop.f32.mrf.mxu1 }
 0x223   : > { %1168 = vtanh.f32 %v726_v7  ;;  %v724_v16 = vmul.f32 0.5, %v708_v11  ;;  %v713_v4 = vadd.f32 %v669_v9, %v1554_v17  ;;  %v661_v21 = vadd.f32 %v1633_v8, %v660_v10 }
 0x224   : > { %v1034_v22 = vpop.f32.mrf.mxu1 }
 0x225   : > { %1170 = vtanh.f32 %v724_v16  ;;  %v1646_v40 = vmul.f32 0.5, %v713_v4  ;;  %v711_v12 = vadd.f32 %v661_v21, %v1544_v13  ;;  %v672_v27 = vadd.f32 %v1034_v22, %v1633_v8 }
 0x226   : > { %v663_v31 = vpop.f32.mrf.mxu1 }
 0x227   : > { %1172 = vtanh.f32 %v1646_v40  ;;  %v1651_v5 = vmul.f32 0.5, %v711_v12  ;;  %v714_v32 = vadd.f32 %v672_v27, %v1557_v18  ;;  %v664_v33 = vadd.f32 %v1633_v8, %v663_v31 }
 0x228   : > { %v1037_v17 = vpop.f32.mrf.mxu1 }
 0x229   : > { %1174 = vtanh.f32 %v1651_v5  ;;  %v1656_v34 = vmul.f32 0.5, %v714_v32  ;;  %v712_v35 = vadd.f32 %v664_v33, %v1547_v14  ;;  %v685_v13 = vadd.f32 %v1037_v17, %v1633_v8 }
 0x22a   : > { %v676_v37 = vpop.f32.mrf.mxu1 }
 0x22b   : > { %1176 = vtanh.f32 %v1656_v34  ;;  %v1661_v59 = vmul.f32 0.5, %v712_v35  ;;  %v717_v62 = vadd.f32 %v685_v13, %v1570_v23  ;;  %v677_v18 = vadd.f32 %v1633_v8, %v676_v37 }
 0x22c   : > { %v1165_v1 = vpop.eup %1164  ;;  %v1038_v38 = vpop.f32.mrf.mxu1 }
 0x22d   : > { %v757_v39 = vadd.f32 1.0, %v1165_v1  ;;  %1178 = vtanh.f32 %v1661_v59  ;;  %v1666_v41 = vmul.f32 0.5, %v717_v62  ;;  %v715_v14 = vadd.f32 %v677_v18, %v1560_v19 }
 0x22e   : > { %v1167_v57 = vpop.eup %1166  ;;  %v688_v42 = vadd.f32 %v1038_v38, %v1633_v8  ;;  %v679_v43 = vpop.f32.mrf.mxu1 }
 0x22f   : > { %v773_v45 = vmul.f32 %v757_v39, %v725_v0  ;;  %v755_v46 = vadd.f32 1.0, %v1167_v57  ;;  %1180 = vtanh.f32 %v1666_v41  ;;  %v1671_v23 = vmul.f32 0.5, %v715_v14 }
 0x230   : > { %v1169_v48 = vpop.eup %1168  ;;  %v718_v49 = vadd.f32 %v688_v42, %v1573_v24  ;;  %v680_v51 = vadd.f32 %v1633_v8, %v679_v43  ;;  %v1041_v55 = vpop.f32.mrf.mxu1 }
 0x231   : > { %789 = vst [vmem:[%s1677_s11 + $0x10] sm:$0xff] %v773_v45  ;;  %v771_v19 = vmul.f32 %v755_v46, %v723_v44  ;;  %v758_v56 = vadd.f32 1.0, %v1169_v48  ;;  %1182 = vtanh.f32 %v1671_v23  ;;  %v701_v15 = vadd.f32 %v1041_v55, %v1633_v8 }
 0x232   : > { %v1171_v28 = vpop.eup %1170  ;;  %v734_v36 = vmul.f32 0.5, %v718_v49  ;;  %v716_v24 = vadd.f32 %v680_v51, %v1563_v20  ;;  %v692_v58 = vpop.f32.mrf.mxu1 }
 0x233   : > { %787 = vst [vmem:[%s1677_s11] sm:$0xff] %v771_v19  ;;  %v774_v60 = vmul.f32 %v758_v56, %v726_v7  ;;  %v756_v61 = vadd.f32 1.0, %v1171_v28  ;;  %v721_v50 = vadd.f32 %v701_v15, %v1586_v29  ;;  %v693_v54 = vadd.f32 %v1633_v8, %v692_v58 }
 0x234   : > { %v1173_v63 = vpop.eup %1172  ;;  %1184 = vtanh.f32 %v734_v36  ;;  %v732_v0 = vmul.f32 0.5, %v716_v24  ;;  %v1042_v52 = vpop.f32.mrf.mxu1 }
 0x235   : > { %790 = vst [vmem:[%s1677_s11 + $0x18] sm:$0xff] %v774_v60  ;;  %v772_v2 = vmul.f32 %v756_v61, %v724_v16  ;;  %v761_v3 = vadd.f32 1.0, %v1173_v63  ;;  %v737_v44 = vmul.f32 0.5, %v721_v50  ;;  %v719_v20 = vadd.f32 %v693_v54, %v1576_v25 }
 0x236   : > { %v1175_v47 = vpop.eup %1174  ;;  %1186 = vtanh.f32 %v732_v0  ;;  %v704_v53 = vadd.f32 %v1042_v52, %v1633_v8  ;;  %v695_v6 = vpop.f32.mrf.mxu1 }
 0x237   : > { %788 = vst [vmem:[%s1677_s11 + $0x8] sm:$0xff] %v772_v2  ;;  %v777_v29 = vmul.f32 %v761_v3, %v1646_v40  ;;  %v759_v7 = vadd.f32 1.0, %v1175_v47  ;;  %1188 = vtanh.f32 %v737_v44  ;;  %v735_v11 = vmul.f32 0.5, %v719_v20 }
 0x238   : > { %v1177_v9 = vpop.eup %1176  ;;  %v722_v10 = vadd.f32 %v704_v53, %v1589_v30  ;;  %v696_v16 = vadd.f32 %v1633_v8, %v695_v6 }
 0x239   : > { %793 = vst [vmem:[%s1677_s11 + $0x30] sm:$0xff] %v777_v29  ;;  %v775_v25 = vmul.f32 %v759_v7, %v1651_v5  ;;  %v762_v4 = vadd.f32 1.0, %v1177_v9  ;;  %1190 = vtanh.f32 %v735_v11 }
 0x23a   : > { %v1179_v21 = vpop.eup %1178  ;;  %v738_v22 = vmul.f32 0.5, %v722_v10  ;;  %v720_v12 = vadd.f32 %v696_v16, %v1579_v26 }
 0x23b   : > { %791 = vst [vmem:[%s1677_s11 + $0x20] sm:$0xff] %v775_v25  ;;  %v778_v40 = vmul.f32 %v762_v4, %v1656_v34  ;;  %v760_v27 = vadd.f32 1.0, %v1179_v21 }
 0x23c   : > { %v1181_v31 = vpop.eup %1180  ;;  %1192 = vtanh.f32 %v738_v22  ;;  %v736_v30 = vmul.f32 0.5, %v720_v12 }
 0x23d   : > { %794 = vst [vmem:[%s1677_s11 + $0x38] sm:$0xff] %v778_v40  ;;  %v776_v8 = vmul.f32 %v760_v27, %v1661_v59  ;;  %v765_v5 = vadd.f32 1.0, %v1181_v31 }
 0x23e   : > { %v1183_v32 = vpop.eup %1182  ;;  %1194 = vtanh.f32 %v736_v30 }
 0x23f   : > { %792 = vst [vmem:[%s1677_s11 + $0x28] sm:$0xff] %v776_v8  ;;  %v781_v33 = vmul.f32 %v765_v5, %v1666_v41  ;;  %v763_v26 = vadd.f32 1.0, %v1183_v32 }
 0x241   : > { %v1185_v17 = vpop.eup %1184  ;;  %797 = vst [vmem:[%s1677_s11 + $0x50] sm:$0xff] %v781_v33  ;;  %v779_v34 = vmul.f32 %v763_v26, %v1671_v23 }
 0x242   : > { %v766_v35 = vadd.f32 1.0, %v1185_v17 }
 0x243   : > { %v1187_v13 = vpop.eup %1186  ;;  %795 = vst [vmem:[%s1677_s11 + $0x40] sm:$0xff] %v779_v34 }
 0x244   : > { %v1189_v37 = vpop.eup %1188  ;;  %v782_v59 = vmul.f32 %v766_v35, %v734_v36  ;;  %v764_v62 = vadd.f32 1.0, %v1187_v13 }
 0x245   : > { %v769_v18 = vadd.f32 1.0, %v1189_v37 }
 0x246   : > { %v1191_v1 = vpop.eup %1190  ;;  %798 = vst [vmem:[%s1677_s11 + $0x58] sm:$0xff] %v782_v59  ;;  %v780_v38 = vmul.f32 %v764_v62, %v732_v0 }
 0x247   : > { %v785_v39 = vmul.f32 %v769_v18, %v737_v44  ;;  %v767_v41 = vadd.f32 1.0, %v1191_v1 }
 0x248   : > { %796 = vst [vmem:[%s1677_s11 + $0x48] sm:$0xff] %v780_v38 }
 0x249   : > { %v1193_v14 = vpop.eup %1192  ;;  %801 = vst [vmem:[%s1677_s11 + $0x70] sm:$0xff] %v785_v39  ;;  %v783_v57 = vmul.f32 %v767_v41, %v735_v11 }
 0x24a   : > { %v770_v42 = vadd.f32 1.0, %v1193_v14 }
 0x24b   : > { %v1195_v43 = vpop.eup %1194  ;;  %799 = vst [vmem:[%s1677_s11 + $0x60] sm:$0xff] %v783_v57 }
 0x24c   : > { %v786_v45 = vmul.f32 %v770_v42, %v738_v22  ;;  %v768_v46 = vadd.f32 1.0, %v1195_v43 }
 0x24e   : > { %802 = vst [vmem:[%s1677_s11 + $0x78] sm:$0xff] %v786_v45  ;;  %v784_v23 = vmul.f32 %v768_v46, %v736_v30 }
 0x250   : > { %800 = vst [vmem:[%s1677_s11 + $0x68] sm:$0xff] %v784_v23 }
 0x251   : > { %1289 = shalt.err (!%p1286_p9)
}
 0x252   : > { %s1290_s30 = scalar_lea.hbm %s1714_s9, 2048  ;;  %s1294_s8 = scalar_lea.hbm %s1766_s5, 4096 }
 0x253   : > { %p1291_p13 = scmp.ne.s32.totalorder %s1714_s9, %s1290_s30  ;;  %p1295_p4 = scmp.lt.s32.totalorder %s1714_s9, %s1766_s5 }
 0x254   : > { %p1296_p8 = scmp.lt.s32.totalorder %s1294_s8, %s1290_s30 }
 0x255   : > { %p1292_p5 = pnand %p1291_p13, %p1782_p10 }
 0x256   : > { %p1297_p3 = por %p1296_p8, %p1295_p4 }
 0x257   : > { %p1293_p0 = pneg %p1292_p5 }
 0x259   : > { %p1298_p11 = pnand %p1297_p3, %p1293_p0 }
 0x25b   : > { %1301 = shalt.err (!%p1298_p11)
}
 0x25c   : > { %s1354_s12 = smov 128   ;;  %s1355_s6 = smov 8  }
 0x25d   : > { %1053 = dma.vmem_to_hbm [thread:$0]  (%p1782_p10), %s1716_s28, 2048, %s1714_s9, %s804_s13, %s1354_s12, %s1354_s12, %s1355_s6  }
 0x25e PF: > { %s832_s7 = sand.u32 1, %s1332_s18   ;;  %p1783_p1 = scmp.ne.s32.totalorder %s1772_s25, 0 }
 0x25f   : > { %p1784_p2 = scmp.ge.s32.totalorder %s1344_s21, 2  ;;  %s833_s22 = scalar_lea.sflag [#allocation4], %s832_s7 }
 0x261   : > { %p1067_p6 = pnand %p1784_p2, %p1783_p1 }
 0x263   : > { %p1068_p12 = pneg %p1067_p6 }
 0x265   : > { %1327 = dma.done.wait (%p1068_p12), %s833_s22, 2048  }
 0x266   : > { %1329 = vsyncadd (%p1068_p12), %s833_s22, 4294965248  ;;  %p19_p7 = scmp.ge.s32.totalorder %s1458_s15, 4   ;;  %s1785_s18 = smov %s1336_s19 }
 0x267   : > { %s1786_s19 = smov %s1340_s20  ;;  %s1787_s20 = smov %s1474_s27 }
 0x268   : > { %s1788_s21 = smov %s1458_s15  ;;  %21 = sbr.rel (!%p19_p7) target bundleno = 6 (0x6), region = 93 }
 0x26d   :  { %838 = vsyncpa [#allocation3], 1 }
 0x26e   :  { %840 = vsyncpa [#allocation3 + $0x1], 1 }
 0x26f   :  { %841 = vsyncpa [#allocation6], 1 }
 0x270   :  { %842 = vsyncpa [#allocation4], 1 }
 0x271   :  { %844 = vsyncpa [#allocation4 + $0x1], 1 }

</bundles_post_ra>
